<compile_context>
chip_gen: v5e
topology: v5e:2x2
jax: 0.10.0
libtpu: 0.0.40
codegen_flags: <defaults>
</compile_context>

<pallas_src>
from functools import partial

import jax
import jax.numpy as jnp
import numpy as np
from jax import lax
from jax.experimental import pallas as pl
from jax.experimental.pallas import tpu as pltpu


def _round_up(x, m):
    return (x + m - 1) // m * m


def _vmem_capacity_bytes():
    """Generation-aware VMEM capacity with a conservative fallback."""
    try:
        info = pltpu.get_tpu_info()
        for name in ("vmem_capacity_bytes", "vmem_size_bytes", "vmem_bytes"):
            cap = getattr(info, name, None)
            if cap:
                return int(cap)
    except Exception:
        pass
    return 64 << 20  # v7x per-TensorCore capacity (the tightest generation)


def _plan_tiles(c_pad, hw, budget_bytes):
    """Return (nt, tile_hw, hw_pad, use_resident) minimizing HBM traffic."""
    hw128 = _round_up(max(hw, 128), 128)
    acc_bytes = c_pad * c_pad * 4 + c_pad * c_pad * 2        # f32 energy + bf16 attn
    stream_col_bytes = 4 * c_pad * 4                         # 2 in + 2 out dbl-buffered f32

    # Mode A: single block covering all of HW -> x read from HBM exactly once
    # (phase-1 block index is identical, so Pallas does not re-DMA it).
    if acc_bytes + stream_col_bytes * hw128 <= budget_bytes:
        return 1, hw128, hw128, False

    # Mode B: streamed tiles + an f32 resident copy of the whole image in VMEM
    # (phase 1 never touches HBM for x).
    if acc_bytes + stream_col_bytes * 128 + c_pad * hw128 * 4 <= budget_bytes:
        for nt in range(2, hw128 // 128 + 1):
            tile = _round_up(-(-hw // nt), 128)
            hw_pad = nt * tile
            need = acc_bytes + stream_col_bytes * tile + c_pad * hw_pad * 4
            if need <= budget_bytes:
                return nt, tile, hw_pad, True

    # Mode C: pure streaming; x is re-read from HBM during phase 1.
    avail = max(budget_bytes - acc_bytes, stream_col_bytes * 128)
    max_cols = max(128, (avail // stream_col_bytes) // 128 * 128)
    nt = -(-hw // max_cols)
    tile = _round_up(-(-hw // nt), 128)
    return nt, tile, nt * tile, False


def _cam_kernel(gamma_ref, x_ref, o_ref, acc_ref, attn_ref, res_ref, *,
                nt, tile_hw, c_valid, c_pad, use_resident):
    k = pl.program_id(1)

    # ---------------- phase 0: energy = x @ x^T over HW tiles ----------------
    @pl.when(k == 0)
    def _():
        acc_ref[...] = jnp.zeros_like(acc_ref)

    @pl.when(k < nt)
    def _():
        x = x_ref[0]                                          # (C_pad, tile_hw) f32
        xb = x.astype(jnp.bfloat16)
        acc_ref[...] += lax.dot_general(
            xb, xb,
            dimension_numbers=(((1,), (1,)), ((), ())),       # x @ x^T
            preferred_element_type=jnp.float32,
        )
        if use_resident:
            start = pl.multiple_of(k * tile_hw, 128)
            res_ref[:, pl.ds(start, tile_hw)] = x             # keep x on-chip

    # ------- end of phase 0: energy -> attention (cached once as bf16) -------
    # softmax(rowmax(E) - E) is row-shift-invariant, so it equals
    # exp(rowmin(E) - E) / rowsum(exp(rowmin(E) - E)): one row reduction only.
    @pl.when(k == nt - 1)
    def _():
        energy = acc_ref[...]                                 # (C_pad, C_pad) f32
        if c_pad != c_valid:
            col = lax.broadcasted_iota(jnp.int32, (c_pad, c_pad), 1)
            energy = jnp.where(col < c_valid, energy, 3.0e38)
        p = jnp.exp(jnp.min(energy, axis=-1, keepdims=True) - energy)
        if c_pad != c_valid:
            col = lax.broadcasted_iota(jnp.int32, (c_pad, c_pad), 1)
            p = jnp.where(col < c_valid, p, 0.0)              # robust explicit mask
        denom = jnp.sum(p, axis=-1, keepdims=True)
        attn_ref[...] = (p * pl.reciprocal(denom, approx=True)).astype(jnp.bfloat16)

    # ---------------- phase 1: out = gamma * (attn @ x) + x -------------------
    @pl.when(k >= nt)
    def _():
        if use_resident:
            start = pl.multiple_of((k - nt) * tile_hw, 128)
            x = res_ref[:, pl.ds(start, tile_hw)]             # f32, from VMEM
        else:
            x = x_ref[0]                                      # f32, (re-)streamed
        out = jnp.dot(attn_ref[...], x.astype(jnp.bfloat16),
                      preferred_element_type=jnp.float32)
        o_ref[0] = (gamma_ref[0] * out + x).astype(o_ref.dtype)


def cam_module(x, gamma, *, vmem_budget_bytes=None):
    """Channel attention module forward.  x: (B, C, H, W) f32, gamma: (1,) f32."""
    B, C, H, W = x.shape
    HW = H * W
    c_pad = _round_up(max(C, 8), 8)

    cap = _vmem_capacity_bytes()
    budget = int(vmem_budget_bytes) if vmem_budget_bytes is not None else int(cap * 0.75)

    nt, tile_hw, hw_pad, use_resident = _plan_tiles(c_pad, HW, budget)

    x_flat = x.reshape(B, C, HW)
    if c_pad != C or hw_pad != HW:
        x_flat = jnp.pad(x_flat, ((0, 0), (0, c_pad - C), (0, hw_pad - HW)))

    gamma = jnp.asarray(gamma, dtype=jnp.float32).reshape(1)

    kernel = partial(_cam_kernel, nt=nt, tile_hw=tile_hw,
                     c_valid=C, c_pad=c_pad, use_resident=use_resident)

    if use_resident:
        # Pin the x block during phase 1 so no HBM re-read happens.
        x_index = lambda b, k: (b, 0, jnp.minimum(k, nt - 1))
        res_shape = (c_pad, hw_pad)
    else:
        x_index = lambda b, k: (b, 0, k % nt)
        res_shape = (8, 128)   # unused dummy scratch

    needed = (c_pad * c_pad * 6                              # f32 energy + bf16 attn
              + 4 * c_pad * tile_hw * 4                      # in/out double buffers
              + res_shape[0] * res_shape[1] * 4)             # resident copy (if any)
    vmem_limit = int(min(max(needed + (8 << 20), 32 << 20), int(cap * 0.9)))

    out_flat = pl.pallas_call(
        kernel,
        out_shape=jax.ShapeDtypeStruct((B, c_pad, hw_pad), x.dtype),
        grid_spec=pltpu.PrefetchScalarGridSpec(
            num_scalar_prefetch=0,
            grid=(B, 2 * nt),
            in_specs=[
                pl.BlockSpec(memory_space=pltpu.MemorySpace.SMEM),   # gamma (1,)
                pl.BlockSpec((1, c_pad, tile_hw), x_index),          # x tiles
            ],
            out_specs=pl.BlockSpec((1, c_pad, tile_hw),
                                   lambda b, k: (b, 0, jnp.maximum(k - nt, 0))),
            scratch_shapes=[
                pltpu.VMEM((c_pad, c_pad), jnp.float32),    # energy accumulator
                pltpu.VMEM((c_pad, c_pad), jnp.bfloat16),   # cached attention
                pltpu.VMEM(res_shape, jnp.float32),         # resident x (Mode B)
            ],
        ),
        compiler_params=pltpu.CompilerParams(
            dimension_semantics=("parallel", "arbitrary"),
            vmem_limit_bytes=vmem_limit,
        ),
    )(gamma, x_flat)

    # Avoid the extra slice copy when no padding was applied.
    if c_pad != C or hw_pad != HW:
        out_flat = out_flat[:, :C, :HW]
    return out_flat.reshape(B, C, H, W)


def _cam_reference(x, gamma, matmul_dtype=jnp.float32):
    """Pure-JAX reference mirroring the PyTorch forward.

    matmul_dtype=jnp.bfloat16 mirrors the kernel's bf16-operand / f32-accumulate
    MXU path (softmax math stays f32) for apples-to-apples comparison.
    """
    B, C, H, W = x.shape
    q = x.reshape(B, C, -1).astype(matmul_dtype)                    # proj_query
    energy = jnp.einsum("bcd,bed->bce", q, q,
                        preferred_element_type=jnp.float32)
    energy_new = jnp.max(energy, axis=-1, keepdims=True) - energy
    attention = jax.nn.softmax(energy_new, axis=-1)
    out = jnp.einsum("bce,bed->bcd", attention.astype(matmul_dtype), q,
                     preferred_element_type=jnp.float32)
    out = out.reshape(B, C, H, W)
    return gamma[0] * out + x


if __name__ == "__main__":
    key = jax.random.PRNGKey(0)
    B, C, H, W = 2, 4, 16, 16
    x = jax.random.normal(key, (B, C, H, W), dtype=jnp.float32)

    # 1) Module as initialized (gamma = zeros(1)): output must equal x.
    gamma0 = jnp.zeros((1,), dtype=jnp.float32)
    out0 = jax.block_until_ready(cam_module(x, gamma0))
    assert out0.shape == (B, C, H, W)
    np.testing.assert_allclose(np.asarray(out0), np.asarray(x), rtol=1e-6, atol=1e-6)

    # 2) Non-trivial gamma vs the bf16-matmul-mirroring reference.
    gamma1 = jnp.full((1,), 0.7, dtype=jnp.float32)
    out1 = jax.block_until_ready(cam_module(x, gamma1))
    ref1 = _cam_reference(x, gamma1, matmul_dtype=jnp.bfloat16)
    np.testing.assert_allclose(np.asarray(out1), np.asarray(ref1), rtol=2e-2, atol=2e-2)

    # 3) Unaligned shapes (C % 8 != 0, H*W % 128 != 0): padding + masked softmax.
    x2 = jax.random.normal(jax.random.PRNGKey(1), (2, 5, 7, 7), dtype=jnp.float32)
    out2 = jax.block_until_ready(cam_module(x2, gamma1))
    ref2 = _cam_reference(x2, gamma1, matmul_dtype=jnp.bfloat16)
    np.testing.assert_allclose(np.asarray(out2), np.asarray(ref2), rtol=2e-2, atol=2e-2)

    # 4) Exercise all traffic modes by forcing small VMEM budgets:
    #    Mode A (single block), Mode B (resident x, nt>1), Mode C (streaming).
    x3 = jax.random.normal(jax.random.PRNGKey(2), (2, 16, 16, 16), dtype=jnp.float32)
    ref3 = _cam_reference(x3, gamma1, matmul_dtype=jnp.bfloat16)
    outA = jax.block_until_ready(cam_module(x3, gamma1))                             # Mode A
    outB = jax.block_until_ready(cam_module(x3, gamma1, vmem_budget_bytes=60_000))   # Mode B
    outC = jax.block_until_ready(cam_module(x3, gamma1, vmem_budget_bytes=40_000))   # Mode C
    np.testing.assert_allclose(np.asarray(outA), np.asarray(ref3), rtol=3e-2, atol=3e-2)
    np.testing.assert_allclose(np.asarray(outB), np.asarray(ref3), rtol=3e-2, atol=3e-2)
    np.testing.assert_allclose(np.asarray(outC), np.asarray(ref3), rtol=3e-2, atol=3e-2)

    print("KERNEL_OK")
</pallas_src>

<mosaic_0001>
module attributes {stable_mosaic.version = 11 : i64} {
  func.func @_cam_kernel(%arg0: i32, %arg1: i32, %arg2: memref<1xf32, #tpu.memory_space<smem>>, %arg3: memref<1x8x256xf32, #tpu.memory_space<vmem>>, %arg4: memref<1x8x256xf32, #tpu.memory_space<vmem>>, %arg5: memref<8x8xf32, #tpu.memory_space<vmem>>, %arg6: memref<8x8xbf16, #tpu.memory_space<vmem>>, %arg7: memref<8x128xf32, #tpu.memory_space<vmem>>) attributes {dimension_semantics = [#tpu.dimension_semantics<parallel>, #tpu.dimension_semantics<arbitrary>], iteration_bounds = array<i64: 2, 2>, scalar_prefetch = 0 : i64, scratch_operands = 3 : i64, tpu.core_type = #tpu.core_type<tc>, window_params = [{transform_indices = @transform_0, window_bounds = array<i64: 1>}, {transform_indices = @transform_1, window_bounds = array<i64: 1, 8, 256>}, {transform_indices = @transform_2, window_bounds = array<i64: 1, 8, 256>}]} {
    %c0_i32 = arith.constant 0 : i32
    %0 = arith.cmpi eq, %arg1, %c0_i32 : i32
    %1 = arith.extui %0 : i1 to i32
    %c0_i32_0 = arith.constant 0 : i32
    %2 = arith.cmpi ne, %1, %c0_i32_0 : i32
    scf.if %2 {
      %cst = arith.constant 0.000000e+00 : f32
      %12 = vector.broadcast %cst : f32 to vector<8x8xf32>
      %c0 = arith.constant 0 : index
      %c0_6 = arith.constant 0 : index
      %13 = vector.load %arg5[%c0, %c0_6] : memref<8x8xf32, #tpu.memory_space<vmem>>, vector<8x8xf32>
      tpu.vector_store %arg5[%c0, %c0_6], %12 {strides = array<i32>} : memref<8x8xf32, #tpu.memory_space<vmem>>, vector<8x8xf32>,
    } else {
    }
    %c1_i32 = arith.constant 1 : i32
    %3 = arith.cmpi slt, %arg1, %c1_i32 : i32
    %4 = arith.extui %3 : i1 to i32
    %c0_i32_1 = arith.constant 0 : i32
    %5 = arith.cmpi ne, %4, %c0_i32_1 : i32
    scf.if %5 {
      %c0 = arith.constant 0 : index
      %c0_6 = arith.constant 0 : index
      %c0_7 = arith.constant 0 : index
      %12 = vector.load %arg3[%c0, %c0_6, %c0_7] : memref<1x8x256xf32, #tpu.memory_space<vmem>>, vector<1x8x256xf32>
      %13 = vector.shape_cast %12 : vector<1x8x256xf32> to vector<8x256xf32>
      %14 = arith.truncf %13 : vector<8x256xf32> to vector<8x256xbf16>
      %c0_8 = arith.constant 0 : index
      %c0_9 = arith.constant 0 : index
      %15 = vector.load %arg5[%c0_8, %c0_9] : memref<8x8xf32, #tpu.memory_space<vmem>>, vector<8x8xf32>
      %cst = arith.constant dense<0.000000e+00> : vector<8x8xf32>
      %16 = tpu.matmul %14, %14, %cst {dimension_numbers = #tpu.dot_dimension_numbers<[1], [1], [0], [0], [0, 0, 1, 0], [], []>} : vector<8x256xbf16>, vector<8x256xbf16>, vector<8x8xf32> -> vector<8x8xf32>
      %17 = arith.addf %15, %16 : vector<8x8xf32>
      %c0_10 = arith.constant 0 : index
      %c0_11 = arith.constant 0 : index
      %18 = vector.load %arg5[%c0_10, %c0_11] : memref<8x8xf32, #tpu.memory_space<vmem>>, vector<8x8xf32>
      tpu.vector_store %arg5[%c0_10, %c0_11], %17 {strides = array<i32>} : memref<8x8xf32, #tpu.memory_space<vmem>>, vector<8x8xf32>,
    } else {
    }
    %c0_i32_2 = arith.constant 0 : i32
    %6 = arith.cmpi eq, %arg1, %c0_i32_2 : i32
    %7 = arith.extui %6 : i1 to i32
    %c0_i32_3 = arith.constant 0 : i32
    %8 = arith.cmpi ne, %7, %c0_i32_3 : i32
    scf.if %8 {
      %c0 = arith.constant 0 : index
      %c0_6 = arith.constant 0 : index
      %12 = vector.load %arg5[%c0, %c0_6] : memref<8x8xf32, #tpu.memory_space<vmem>>, vector<8x8xf32>
      %13 = tpu.iota {dimensions = array<i32: 1>} : vector<8x8xi32>
      %c4_i32 = arith.constant 4 : i32
      %14 = vector.broadcast %c4_i32 : i32 to vector<8x8xi32>
      %15 = arith.cmpi slt, %13, %14 : vector<8x8xi32>
      %cst = arith.constant 3.000000e+38 : f32
      %16 = vector.broadcast %cst : f32 to vector<8x8xf32>
      %17 = arith.select %15, %12, %16 : vector<8x8xi1>, vector<8x8xf32>
      %cst_7 = arith.constant dense<0x7F800000> : vector<8xf32>
      %18 = vector.multi_reduction <minimumf>, %17, %cst_7 [1] : vector<8x8xf32> to vector<8xf32>
      %19 = vector.shape_cast %18 : vector<8xf32> to vector<8x1xf32>
      %20 = vector.broadcast %19 : vector<8x1xf32> to vector<8x8xf32>
      %21 = arith.subf %20, %17 : vector<8x8xf32>
      %22 = math.exp %21 : vector<8x8xf32>
      %23 = tpu.iota {dimensions = array<i32: 1>} : vector<8x8xi32>
      %c4_i32_8 = arith.constant 4 : i32
      %24 = vector.broadcast %c4_i32_8 : i32 to vector<8x8xi32>
      %25 = arith.cmpi slt, %23, %24 : vector<8x8xi32>
      %cst_9 = arith.constant 0.000000e+00 : f32
      %26 = vector.broadcast %cst_9 : f32 to vector<8x8xf32>
      %27 = arith.select %25, %22, %26 : vector<8x8xi1>, vector<8x8xf32>
      %cst_10 = arith.constant dense<0.000000e+00> : vector<8xf32>
      %28 = vector.multi_reduction <add>, %27, %cst_10 [1] : vector<8x8xf32> to vector<8xf32>
      %29 = vector.shape_cast %28 : vector<8xf32> to vector<8x1xf32>
      %30 = tpu.reciprocal %29 {approx = true} : vector<8x1xf32> -> vector<8x1xf32>
      %31 = vector.broadcast %30 : vector<8x1xf32> to vector<8x8xf32>
      %32 = arith.mulf %27, %31 : vector<8x8xf32>
      %33 = arith.truncf %32 : vector<8x8xf32> to vector<8x8xbf16>
      %c0_11 = arith.constant 0 : index
      %c0_12 = arith.constant 0 : index
      %34 = vector.load %arg6[%c0_11, %c0_12] : memref<8x8xbf16, #tpu.memory_space<vmem>>, vector<8x8xbf16>
      tpu.vector_store %arg6[%c0_11, %c0_12], %33 {strides = array<i32>} : memref<8x8xbf16, #tpu.memory_space<vmem>>, vector<8x8xbf16>,
    } else {
    }
    %c1_i32_4 = arith.constant 1 : i32
    %9 = arith.cmpi sge, %arg1, %c1_i32_4 : i32
    %10 = arith.extui %9 : i1 to i32
    %c0_i32_5 = arith.constant 0 : i32
    %11 = arith.cmpi ne, %10, %c0_i32_5 : i32
    scf.if %11 {
      %c0 = arith.constant 0 : index
      %c0_6 = arith.constant 0 : index
      %c0_7 = arith.constant 0 : index
      %12 = vector.load %arg3[%c0, %c0_6, %c0_7] : memref<1x8x256xf32, #tpu.memory_space<vmem>>, vector<1x8x256xf32>
      %13 = vector.shape_cast %12 : vector<1x8x256xf32> to vector<8x256xf32>
      %c0_8 = arith.constant 0 : index
      %c0_9 = arith.constant 0 : index
      %14 = vector.load %arg6[%c0_8, %c0_9] : memref<8x8xbf16, #tpu.memory_space<vmem>>, vector<8x8xbf16>
      %15 = arith.truncf %13 : vector<8x256xf32> to vector<8x256xbf16>
      %cst = arith.constant dense<0.000000e+00> : vector<8x256xf32>
      %16 = tpu.matmul %14, %15, %cst {dimension_numbers = #tpu.dot_dimension_numbers<[1], [0], [0], [1], [0, 0, 1, 1], [], []>} : vector<8x8xbf16>, vector<8x256xbf16>, vector<8x256xf32> -> vector<8x256xf32>
      %c0_10 = arith.constant 0 : index
      %17 = memref.load %arg2[%c0_10] : memref<1xf32, #tpu.memory_space<smem>>
      %18 = vector.broadcast %17 : f32 to vector<8x256xf32>
      %19 = arith.mulf %18, %16 : vector<8x256xf32>
      %20 = arith.addf %19, %13 : vector<8x256xf32>
      %c0_11 = arith.constant 0 : index
      %c0_12 = arith.constant 0 : index
      %c0_13 = arith.constant 0 : index
      %21 = vector.load %arg4[%c0_11, %c0_12, %c0_13] : memref<1x8x256xf32, #tpu.memory_space<vmem>>, vector<1x8x256xf32>
      %22 = vector.shape_cast %21 : vector<1x8x256xf32> to vector<8x256xf32>
      %23 = vector.shape_cast %20 : vector<8x256xf32> to vector<1x8x256xf32>
      tpu.vector_store %arg4[%c0_11, %c0_12, %c0_13], %23 {strides = array<i32>} : memref<1x8x256xf32, #tpu.memory_space<vmem>>, vector<1x8x256xf32>,
    } else {
    }
    return
  }
  func.func @transform_0(%arg0: i32, %arg1: i32) -> i32 {
    %c0_i32 = arith.constant 0 : i32
    %c0_i32_0 = arith.constant 0 : i32
    return %c0_i32 : i32
  }
  func.func @transform_1(%arg0: i32, %arg1: i32) -> (i32, i32, i32) {
    %c1_i32 = arith.constant 1 : i32
    %c0_i32 = arith.constant 0 : i32
    %0 = arith.cmpi eq, %c1_i32, %c0_i32 : i32
    %c1_i32_0 = arith.constant 1 : i32
    %1 = arith.select %0, %c1_i32_0, %c1_i32 : i32
    %2 = arith.remsi %arg1, %1 : i32
    %c0_i32_1 = arith.constant 0 : i32
    %3 = arith.cmpi ne, %2, %c0_i32_1 : i32
    %c0_i32_2 = arith.constant 0 : i32
    %4 = arith.cmpi slt, %2, %c0_i32_2 : i32
    %c0_i32_3 = arith.constant 0 : i32
    %5 = arith.cmpi slt, %1, %c0_i32_3 : i32
    %6 = arith.xori %4, %5 : i1
    %7 = arith.andi %6, %3 : i1
    %8 = arith.addi %2, %1 : i32
    %9 = arith.select %7, %8, %2 : i32
    %c0_i32_4 = arith.constant 0 : i32
    %c0_i32_5 = arith.constant 0 : i32
    return %arg0, %c0_i32_4, %9 : i32, i32, i32
  }
  func.func @transform_2(%arg0: i32, %arg1: i32) -> (i32, i32, i32) {
    %c1_i32 = arith.constant 1 : i32
    %0 = arith.subi %arg1, %c1_i32 : i32
    %c0_i32 = arith.constant 0 : i32
    %1 = arith.maxsi %0, %c0_i32 : i32
    %c0_i32_0 = arith.constant 0 : i32
    %c0_i32_1 = arith.constant 0 : i32
    return %arg0, %c0_i32_0, %1 : i32, i32, i32
  }
}

</mosaic_0001>

<bundles_post_ra>
// kernel: tpu_custom_call.1
= control target key start
LH: loop header
LB: loop body
LE: loop exit
PB: predicated region body
PF: predicated region fallthrough
CT: control target
= control target key end

     0   :  { %s908_s0 = inlined_call_operand.<no memory space> [shape: f32[1], index: 0, kind: input, shape index: {}]   ;;  %s909_s1 = inlined_call_operand.hbm [shape: f32[2,8,256], index: 1, kind: input, shape index: {}]   ;;  %s910_s2 = inlined_call_operand.hbm [shape: f32[2,8,256], index: 2, kind: output, shape index: {}]  }
   0x1   :  { %7 = sst [smem:[#allocation5]] %s908_s0 }
   0x2   :  { %8 = vsyncpa [#allocation7], 0 }
   0x3   :  { %10 = vsyncpa [#allocation7 + $0x1], 0 }
   0x4   :  { %11 = vsyncpa [#allocation8], 0 }
   0x5   :  { %13 = vsyncpa [#allocation8 + $0x1], 0  ;;  %s722_s11 = smov 0   ;;  %s724_s12 = smov 0  }
   0x6   :  { %s726_s13 = smov 0   ;;  %s728_s14 = smov 0  }
   0x7   :  { %s730_s15 = smov 0   ;;  %s732_s16 = smov 0  }
   0x8   :  { %s734_s17 = smov 0   ;;  %s736_s18 = smov 0  }
   0x9   :  { %s738_s0 = smov 0   ;;  %s740_s19 = smov 0  }
   0xa   :  { %s742_s20 = smov 0  }
   0xb LB: > { %s416_s21 = sadd.s32 4294967295, %s701_s20   ;;  %s417_s22 = sadd.s32 4294967294, %s701_s20   ;;  %s701_s20 = sphi %s742_s20, %s19_s20   ;;  %s697_s19 = sphi %s740_s19, %s929_s19   ;;  %s693_s0 = sphi %s738_s0, %s928_s0   ;;  %s689_s18 = sphi %s736_s18, %s927_s18   ;;  %s685_s17 = sphi %s734_s17, %s926_s17   ;;  %s681_s16 = sphi %s732_s16, %s925_s16   ;;  %s677_s15 = sphi %s730_s15, %s924_s15   ;;  %s673_s14 = sphi %s728_s14, %s923_s14   ;;  %s669_s13 = sphi %s726_s13, %s922_s13   ;;  %s665_s12 = sphi %s724_s12, %s921_s12   ;;  %s661_s11 = sphi %s722_s11, %s920_s11  }
   0xc   : > { %s28_s23 = sadd.s32 1, %s693_s0  ;;  %s31_s24 = sadd.s32 1, %s697_s19 }
   0xd   : > { %p29_p0 = scmp.ge.s32.totalorder %s28_s23, 2  ;;  %s59_s25 = sadd.s32 1, %s681_s16 }
   0xe   : > { %p66_p1 = scmp.ne.s32.totalorder %s681_s16, %s677_s15  ;;  %p67_p2 = scmp.eq.s32.totalorder %s701_s20, 0 }
   0xf   : > { %s931_s23 = smov (%p29_p0, %s28_s23), 0  ;;  %s933_s24 = smov (!%p29_p0, %s31_s24), %s697_s19 }
  0x10   : > { %912 = sst [smem:[#allocation12_spill]] %s931_s23  ;;  %p786_p3 = por %p67_p2, %p66_p1 }
  0x11   : > { %p72_p4 = scmp.ne.s32.totalorder %s677_s15, %s673_s14  ;;  %p33_p5 = scmp.ge.s32.totalorder %s933_s24, 2 }
  0x12   : > { %p73_p6 = scmp.eq.s32.totalorder %s416_s21, 0  ;;  %s93_s29 = sadd.s32 1, %s669_s13 }
  0x13   : > { %s935_s24 = smov (%p33_p5, %s933_s24), 0  ;;  %p103_p9 = scmp.ne.s32.totalorder %s669_s13, %s665_s12 }
  0x14   : > { %914 = sst [smem:[#allocation13_spill]] %s935_s24  ;;  %p793_p7 = por %p73_p6, %p72_p4 }
  0x15   : > { %s56_s28 = ssub.s32 %s697_s19, %s935_s24  ;;  %p104_p10 = scmp.eq.s32.totalorder %s416_s21, 3 }
  0x16   : > { %p57_p8 = scmp.eq.s32.totalorder %s56_s28, 0  ;;  %p109_p11 = scmp.ne.s32.totalorder %s665_s12, %s661_s11 }
  0x17   : > { %p807_p12 = por %p104_p10, %p103_p9  ;;  %p110_p13 = scmp.eq.s32.totalorder %s417_s22, 3 }
  0x18   : > { %s801_s30 = scalar_select %p57_p8, %s681_s16, %s59_s25  }
  0x19   : > { %p454_p0 = scmp.lt.s32.totalorder %s701_s20, 4  ;;  %p815_p1 = por %p110_p13, %p109_p11 }
  0x1a   : > { %s813_s4 = scalar_select %p57_p8, %s669_s13, %s93_s29  }
  0x1b   : > { %s133_s6 = sand.u32 1, %s681_s16   ;;  %s441_s8 = sshll.u32 %s697_s19, 4 }
  0x1c   : > { %s422_s7 = sshll.u32 %s133_s6, 4  ;;  %s142_s14 = scalar_lea.hbm %s909_s1, %s441_s8 }
  0x1d   : > { %s137_s21 = scalar_lea.vmem [#allocation6], %s422_s7  ;;  %s144_s28 = sshll.u32 %s142_s14, 4  ;;  %s145_s28 = int_to_ptr.hbm [resolvable:$true] %s144_s28 }
  0x1e   : > { %s146_s25 = sshll.u32 %s137_s21, 4  ;;  %p447_p2 = pnand %p454_p0, %p786_p3  ;;  %s147_s25 = int_to_ptr.vmem [resolvable:$true] %s146_s25 }
  0x1f   : > { %p425_p4 = scmp.ge.s32.totalorder %s701_s20, 1  ;;  %p151_p5 = scmp.lt.s32.totalorder %s701_s20, 5 }
  0x20   : > { %s134_s22 = scalar_lea.sflag [#allocation7], %s133_s6 }
  0x21   : > { %449 = dma.hbm_to_vmem [thread:$0]  (!%p447_p2), %s145_s28, 256, %s147_s25, %s134_s22  }
  0x22   : > { %p152_p6 = pnand %p425_p4, %p151_p5 }
  0x23   : > { %s157_s29 = sand.u32 (!%p152_p6), 1, %s677_s15  }
  0x24   : > { %155 = sbr.rel (%p152_p6) target bundleno = 640 (0x280), region = 28  ;;  %s426_s24 = sshll.u32 (!%p152_p6), %s157_s29, 4 }
  0x25   : > { %s158_s23 = scalar_lea.sflag (!%p152_p6), [#allocation7], %s157_s29  ;;  %s829_s9 = scalar_lea.vmem (!%p152_p6), [#allocation6], %s426_s24 }
  0x29   : > { %652 = dma.done.wait (%p793_p7), %s158_s23, 256  }
  0x2a   : > { %654 = vsyncadd (%p793_p7), %s158_s23, 4294967040  ;;  %s180_s26 = sand.u32 1, %s665_s12   ;;  %p428_p3 = scmp.ne.s32.totalorder %s685_s17, 0 }
  0x2b   : > { %s427_s6 = sshll.u32 %s180_s26, 4 }
  0x2c   : > { %s838_s7 = scalar_lea.vmem [#allocation9], %s427_s6  ;;  %191 = sbr.rel (%p428_p3) target bundleno = 51 (0x33), region = 36 }
  0x31   : > { %vm192_vm0 = vcmask 64512   ;;  %v703_v0 = vmov 0.0  }
  0x32   : > { %193 = vst.msk [vmem:[#allocation2] sm:$0xff] %vm192_vm0, %v703_v0 }
  0x33 PF: > { %p429_p8 = scmp.ge.s32.totalorder %s685_s17, 1 }
  0x35   : > { %197 = sbr.rel (%p429_p8) target bundleno = 202 (0xca), region = 40 }
  0x3a   : > { %v198_v1 = vld [vmem:[%s829_s9] sm:$0xff]  ;;  %v199_v2 = vld [vmem:[%s829_s9 + $0x8] sm:$0xff]  ;;  %vm230_vm1 = vcmask 64512  }
  0x3b   : > { %v200_v3 = vpack.c.bf16 %v198_v1, %v198_v1  ;;  %v201_v4 = vpack.c.bf16 %v199_v2, %v199_v2  ;;  %v202_v6 = vld [vmem:[#allocation2] sm:$0xff] }
  0x3d   : > { %210 = vmatpush.bf16.xpose.msra.mxu0 %v200_v3  ;;  %223 = vmatpush.bf16.xpose.msra.mxu1 %v201_v4 }
  0x44   : > { %211 = vmatmul.bf16.vlgmr.msra.gmra.mxu0 %v200_v3  ;;  %224 = vmatmul.bf16.vlgmr.msra.gmra.mxu1 %v201_v4 }
  0xc1   : > { %v212_v5 = vpop.f32.mrf.mxu0  ;;  %v225_v7 = vpop.f32.mrf.mxu1 }
  0xc2   : > { %v226_v8 = vadd.f32 %v225_v7, %v212_v5 }
  0xc4   : > { %v229_v9 = vadd.f32 %v226_v8, %v202_v6 }
  0xc6   : > { %231 = vst.msk [vmem:[#allocation2] sm:$0xff] %vm230_vm1, %v229_v9 }
  0xc9   : > { %v214_v10 = vpop.f32.mrf.mxu0  ;;  %v227_v11 = vpop.f32.mrf.mxu1 }
  0xca PF: > { %234 = sbr.rel (%p428_p3) target bundleno = 471 (0x1d7), region = 44 }
  0xcf   : > { %v236_v12 = vlaneseq  ;;  %v235_v13 = vld [vmem:[#allocation2] sm:$0xff]  ;;  %vm240_vm2 = vcmask 64512   ;;  %vm254_vm4 = vcmask 60416  }
  0xd1   : > { %v237_v14 = vand.u32 127, %v236_v12 }
  0xd3   : > { %vm238_vm3 = vcmp.lt.s32.totalorder %v237_v14, 4 }
  0xd4   : > { %v239_v15 = vsel %vm238_vm3, %v235_v13, 3e+38 }
  0xd5   : > { %v241_v16 = vsel %vm240_vm2, %v239_v15, inf }
  0xd6   : > { %242 = vmin.xlane.f32.xlu0 %v241_v16 }
 0x149   : > { %v243_v17 = vpop.xlane.xlu0 %242 }
 0x14a   : > { %v244_v18 = vsub.f32 %v243_v17, %v239_v15 }
 0x14c   : > { %v245_v19 = vmul.f32 1.442695, %v244_v18 }
 0x14e   : > { %545 = vpow2.f32 %v245_v19 }
 0x154   : > { %v546_v20 = vpop.eup %545 }
 0x155   : > { %v247_v21 = vsel %vm238_vm3, %v546_v20, 0.0 }
 0x156   : > { %v248_v22 = vsel %vm240_vm2, %v247_v21, 0.0 }
 0x157   : > { %249 = vadd.xlane.f32.xlu0 %v248_v22 }
 0x1ca   : > { %v250_v23 = vpop.xlane.xlu0 %249 }
 0x1cb   : > { %547 = vrcp.f32 %v250_v23 }
 0x1d1   : > { %v548_v24 = vpop.eup %547 }
 0x1d2   : > { %v252_v25 = vmul.f32 %v548_v24, %v247_v21 }
 0x1d4   : > { %v253_v26 = vpack.c.bf16 %v252_v25, %v252_v25 }
 0x1d6   : > { %255 = vst.msk [vmem:[#allocation3] sm:$0xf] %vm254_vm4, %v253_v26 }
 0x1d7 PF: > { %p431_p7 = scmp.lt.s32.totalorder %s685_s17, 1 }
 0x1d8   : > { %s302_s23 = sld [smem:[#allocation5]] (!%p431_p7) }
 0x1d9   : > { %259 = sbr.rel (%p431_p7) target bundleno = 619 (0x26b), region = 48 }
 0x1de   : > { %v260_v27 = vld [vmem:[%s829_s9] sm:$0xff]  ;;  %vm269_vm5 = vcmask 1043456   ;;  %v261_v28 = vld [vmem:[%s829_s9 + $0x8] sm:$0xff]  ;;  %vm265_vm6 = vcmask 64512   ;;  %v303_v34 = vstv %s302_s23 }
 0x1df   : > { %v263_v29 = vpack.c.bf16 %v260_v27, %v260_v27  ;;  %v264_v30 = vpack.c.bf16 %v261_v28, %v261_v28  ;;  %v262_v33 = vld [vmem:[#allocation3] sm:$0xf] }
 0x1e1   : > { %v271_v31 = vsel %vm269_vm5, %v263_v29, 0  ;;  %v274_v32 = vsel %vm269_vm5, %v264_v30, 0 }
 0x1e2   : > { %283 = vmatpush.bf16.msra.mxu0 %v271_v31  ;;  %296 = vmatpush.bf16.msra.mxu1 %v274_v32 }
 0x1e5   : > { %432 = vmatmul.msk.bf16.vlgmr.msra.gmra.mxu0 %vm265_vm6, %v262_v33  ;;  %433 = vmatmul.msk.bf16.vlgmr.msra.gmra.mxu1 %vm265_vm6, %v262_v33 }
 0x262   : > { %v285_v35 = vpop.f32.mrf.mxu0  ;;  %v298_v36 = vpop.f32.mrf.mxu1 }
 0x263   : > { %v304_v37 = vmul.f32 %v303_v34, %v285_v35  ;;  %v305_v38 = vmul.f32 %v303_v34, %v298_v36 }
 0x265   : > { %v306_v39 = vadd.f32 %v304_v37, %v260_v27  ;;  %v307_v40 = vadd.f32 %v305_v38, %v261_v28 }
 0x267   : > { %308 = vst [vmem:[%s838_s7] sm:$0xff] %v306_v39 }
 0x268   : > { %309 = vst [vmem:[%s838_s7 + $0x8] sm:$0xff] %v307_v40 }
 0x26a   : > { %v287_v41 = vpop.f32.mrf.mxu0  ;;  %v300_v42 = vpop.f32.mrf.mxu1 }
 0x26b PF: > { %s435_s24 = sadd.s32 4294967295, %s685_s17  ;;  %s437_s27 = sshll.u32 %s689_s18, 1 }
 0x26c   : > { %p319_p9 = scmp.gt.s32.totalorder %s435_s24, 0  ;;  %s329_s10 = sshll.u32 %s838_s7, 4  ;;  %s330_s10 = int_to_ptr.vmem [resolvable:$true] %s329_s10 }
 0x26d   : > { %s311_s9 = scalar_lea.sflag [#allocation8], %s180_s26  ;;  %s599_s23 = scalar_lea.hbm %s910_s2, 32 }
 0x26e   : > { %s937_s24 = smov (!%p319_p9, %s435_s24), 0 }
 0x26f   : > { %s436_s8 = sshll.u32 %s937_s24, 1 }
 0x270   : > { %s325_s14 = sadd.s32 %s437_s27, %s436_s8 }
 0x271   : > { %s438_s21 = sshll.u32 %s325_s14, 3 }
 0x272   : > { %s327_s22 = scalar_lea.hbm %s910_s2, %s438_s21 }
 0x273   : > { %s331_s29 = sshll.u32 %s327_s22, 4  ;;  %s332_s29 = int_to_ptr.hbm [resolvable:$true] %s331_s29 }
 0x274   : > { %s593_s6 = sshra.s32 %s332_s29, 4  ;;  %s594_s6 = int_to_ptr.hbm [resolvable:$true] %s593_s6 }
 0x275   : > { %s595_s17 = scalar_lea.hbm %s594_s6, 16  ;;  %p600_p0 = scmp.lt.s32.totalorder %s594_s6, %s910_s2 }
 0x276   : > { %p596_p10 = scmp.ne.s32.totalorder %s594_s6, %s595_s17  ;;  %p601_p2 = scmp.lt.s32.totalorder %s599_s23, %s595_s17 }
 0x278   : > { %p597_p11 = pnand %p596_p10, %p807_p12  ;;  %p602_p4 = por %p601_p2, %p600_p0 }
 0x27a   : > { %p598_p13 = pneg %p597_p11 }
 0x27c   : > { %p603_p5 = pnand %p602_p4, %p598_p13 }
 0x27e   : > { %606 = shalt.err (!%p603_p5)
}
 0x27f   : > { %444 = dma.vmem_to_hbm [thread:$0]  (%p807_p12), %s330_s10, 256, %s332_s29, %s311_s9  }
 0x280 PF: > { %p455_p6 = scmp.ge.s32.totalorder %s701_s20, 2  ;;  %s343_s26 = sand.u32 1, %s661_s11  }
 0x281   : > { %s344_s8 = scalar_lea.sflag [#allocation8], %s343_s26 }
 0x282   : > { %p451_p3 = pnand %p455_p6, %p815_p1 }
 0x284   : > { %p452_p8 = pneg %p451_p3 }
 0x286   : > { %656 = dma.done.wait (%p452_p8), %s344_s8, 256  }
 0x287   : > { %658 = vsyncadd (%p452_p8), %s344_s8, 4294967040  ;;  %s19_s20 = sadd.s32 1, %s701_s20   ;;  %s918_s3 = sld [smem:[#allocation12_spill]] }
 0x288   : > { %p16_p7 = scmp.ge.s32.totalorder %s19_s20, 6   ;;  %s919_s10 = sld [smem:[#allocation13_spill]] }
 0x289   : > { %s920_s11 = smov %s665_s12  ;;  %s921_s12 = smov %s669_s13 }
 0x28a   : > { %s922_s13 = smov %s813_s4  ;;  %s923_s14 = smov %s677_s15 }
 0x28b   : > { %s924_s15 = smov %s681_s16  ;;  %s925_s16 = smov %s801_s30 }
 0x28c   : > { %s926_s17 = smov %s693_s0  ;;  %s927_s18 = smov %s697_s19 }
 0x28d   : > { %s928_s0 = smov %s918_s3  ;;  %18 = sbr.rel (!%p16_p7) target bundleno = 11 (0xb), region = 89 }
 0x28e   : > { %s929_s19 = smov %s919_s10 }
 0x292   :  { %350 = vsyncpa [#allocation7], 1 }
 0x293   :  { %352 = vsyncpa [#allocation7 + $0x1], 1 }
 0x294   :  { %353 = vsyncpa [#allocation8], 1 }
 0x295   :  { %355 = vsyncpa [#allocation8 + $0x1], 1 }

</bundles_post_ra>
